<compile_context>
chip_gen: v6e
topology: v6e:2x2x1
jax: 0.10.0
libtpu: 0.0.40
codegen_flags: <defaults>
</compile_context>

<pallas_src>
import jax
import jax.numpy as jnp
from jax.experimental import pallas as pl
from jax.experimental.pallas import tpu as pltpu

LANE = 128
MIN_STD = 1e-8


def _round_up(n, m):
    return ((n + m - 1) // m) * m


def _softplus(x):
    # Matches torch.nn.functional.softplus(x) with beta=1, threshold=20.
    return jnp.where(x > 20.0, x, jnp.log1p(jnp.exp(jnp.minimum(x, 20.0))))


def _make_kernel(h_pad):
    """Kernel closure over the (static) padded hidden size."""
    zrows = LANE - h_pad

    def kernel(x_ref, small_ref, big_ref, o_ref):
        # ---- sample the small parameters (layer-1 weight row + all biases) ----
        # small slab rows: [0:8) mu, [8:16) rho, [16:24) eps; within each group
        # row 0 = w1, row 1 = b1, row 2 = b2, row 3 = b3 (rest zero).
        sm = small_ref[...]                                           # (24, 128)
        vec = sm[0:8, :] + _softplus(sm[8:16, :]) * sm[16:24, :]      # (8, 128)
        w1 = vec[0:1, :]
        b1 = vec[1:2, :]
        b2 = vec[2:3, :]
        b3 = vec[3:4, :]

        # ---- sample the live rows of W2 / W3 and zero-extend to (128,128) ----
        big = big_ref[...]                                            # (6*h_pad, 128)
        mu = big[0:2 * h_pad, :]
        rho = big[2 * h_pad:4 * h_pad, :]
        eps = big[4 * h_pad:6 * h_pad, :]
        live = mu + _softplus(rho) * eps                              # (2*h_pad, 128)
        zpad = jnp.zeros((zrows, LANE), jnp.float32)
        w2 = jnp.concatenate([live[0:h_pad, :], zpad], axis=0)        # (128, 128)
        w3 = jnp.concatenate([live[h_pad:2 * h_pad, :], zpad], axis=0)

        # ---- forward pass ----
        x = x_ref[...]                                                # (TILE_B, 1)
        h1 = x * w1 + b1                                              # outer product (VPU)
        a1 = jnp.maximum(h1, 0.0)                                     # act_func = relu
        h2 = jnp.dot(a1, w2, preferred_element_type=jnp.float32) + b2
        a2 = jnp.maximum(h2, 0.0)
        h3 = jnp.dot(a2, w3, preferred_element_type=jnp.float32) + b3

        o_ref[...] = h3                                               # raw head outputs

    return kernel


def bbb_het_reg_forward(x, params, tile_b=1024):
    """x: (B, 1) float32. Returns (means (B,1), stds (B,1))."""
    b, in_dim = x.shape
    assert in_dim == 1, "kernel implements the module default input_size=1"
    small = params["small"].astype(jnp.float32)
    big = params["big"].astype(jnp.float32)
    h_pad = big.shape[0] // 6

    tb = _round_up(min(int(tile_b), _round_up(b, 8)), 8)
    b_pad = _round_up(b, tb)
    grid = b_pad // tb

    x_p = jnp.zeros((b_pad, 1), jnp.float32).at[:b, :].set(x.astype(jnp.float32))

    kernel = _make_kernel(h_pad)
    flops = 2 * 2 * b_pad * LANE * LANE + 6 * b_pad * LANE
    transcendentals = grid * (8 + 4 * h_pad) * LANE * 2
    bytes_accessed = 4 * (b_pad * 1 + grid * (small.size + big.size) + b_pad * LANE)

    h3 = pl.pallas_call(
        kernel,
        out_shape=jax.ShapeDtypeStruct((b_pad, LANE), jnp.float32),
        grid=(grid,),
        in_specs=[
            pl.BlockSpec((tb, 1), lambda i: (i, 0)),          # x column
            pl.BlockSpec(small.shape, lambda i: (0, 0)),      # small param slab (resident)
            pl.BlockSpec(big.shape, lambda i: (0, 0)),        # big param slab (resident)
        ],
        out_specs=pl.BlockSpec((tb, LANE), lambda i: (i, 0)),
        compiler_params=pltpu.CompilerParams(
            dimension_semantics=("parallel",)),
        cost_estimate=pl.CostEstimate(
            flops=int(flops),
            transcendentals=int(transcendentals),
            bytes_accessed=int(bytes_accessed)),
    )(x_p, small, big)

    means = h3[:b, 0:1]
    stds = MIN_STD + _softplus(h3[:b, 1:2])
    return means, stds


def init_params(key, input_size=1, hidden_size=10):
    """Packed, deterministic synthetic init following the module's posterior initials.

    posterior_mu_initial = (0, std), posterior_rho_initial = (-13, 1e-8);
    eps ~ N(0,1) is the reparameterization noise (sample=True path).
    Padded regions have mu = eps = 0, so padded weights sample to exactly 0.
    Weights are stored as (in_features, out_features) so y = x @ W + b == F.linear.
    """
    assert input_size == 1
    H = hidden_size
    H_PAD = _round_up(H, 8)
    mu_std1 = 1.0 / (3.0 * H) ** 0.5
    mu_std2 = 1.0 / (4.0 * H) ** 0.5
    mu_std3 = 1.0 / (4.0 * 2.0) ** 0.5

    keys = jax.random.split(key, 18)

    def mu(k, shape, s):
        return s * jax.random.normal(k, shape, jnp.float32)

    def rho(k, shape):
        return -13.0 + 1e-8 * jax.random.normal(k, shape, jnp.float32)

    def eps(k, shape):
        return jax.random.normal(k, shape, jnp.float32)

    w1_mu, w1_rho, w1_eps = mu(keys[0], (H,), mu_std1), rho(keys[1], (H,)), eps(keys[2], (H,))
    b1_mu, b1_rho, b1_eps = mu(keys[3], (H,), mu_std1), rho(keys[4], (H,)), eps(keys[5], (H,))
    w2_mu, w2_rho, w2_eps = mu(keys[6], (H, H), mu_std2), rho(keys[7], (H, H)), eps(keys[8], (H, H))
    b2_mu, b2_rho, b2_eps = mu(keys[9], (H,), mu_std2), rho(keys[10], (H,)), eps(keys[11], (H,))
    w3_mu, w3_rho, w3_eps = mu(keys[12], (H, 2), mu_std3), rho(keys[13], (H, 2)), eps(keys[14], (H, 2))
    b3_mu, b3_rho, b3_eps = mu(keys[15], (2,), mu_std3), rho(keys[16], (2,)), eps(keys[17], (2,))

    # small slab: rows [0:8) mu, [8:16) rho, [16:24) eps; rows 0..3 = w1,b1,b2,b3.
    small = jnp.zeros((24, LANE), jnp.float32)
    groups = [(w1_mu, b1_mu, b2_mu, b3_mu),
              (w1_rho, b1_rho, b2_rho, b3_rho),
              (w1_eps, b1_eps, b2_eps, b3_eps)]
    for g, (wv, b1v, b2v, b3v) in enumerate(groups):
        base = 8 * g
        small = small.at[base + 0, :wv.shape[0]].set(wv)
        small = small.at[base + 1, :b1v.shape[0]].set(b1v)
        small = small.at[base + 2, :b2v.shape[0]].set(b2v)
        small = small.at[base + 3, :b3v.shape[0]].set(b3v)

    # big slab: rows [0:2H_PAD) mu, [2H_PAD:4H_PAD) rho, [4H_PAD:6H_PAD) eps;
    # within each group: first H_PAD rows = W2 (H,H live), next H_PAD rows = W3 (H,2 live).
    big = jnp.zeros((6 * H_PAD, LANE), jnp.float32)
    wgroups = [(w2_mu, w3_mu), (w2_rho, w3_rho), (w2_eps, w3_eps)]
    for g, (w2v, w3v) in enumerate(wgroups):
        base = 2 * H_PAD * g
        big = big.at[base:base + H, :H].set(w2v)
        big = big.at[base + H_PAD:base + H_PAD + H, :2].set(w3v)

    return {"small": small, "big": big, "hidden": H}


def reference_forward(x, params):
    """Pure-JAX reference on the unpacked logical weights (validates packing + kernel)."""
    small, big, H = params["small"], params["big"], params["hidden"]
    H_PAD = big.shape[0] // 6

    def samp(m, r, e):
        return m + _softplus(r) * e

    w1 = samp(small[0, :H], small[8, :H], small[16, :H])          # (H,)
    b1 = samp(small[1, :H], small[9, :H], small[17, :H])          # (H,)
    b2 = samp(small[2, :H], small[10, :H], small[18, :H])         # (H,)
    b3 = samp(small[3, :2], small[11, :2], small[19, :2])         # (2,)
    w2 = samp(big[0:H, :H], big[2 * H_PAD:2 * H_PAD + H, :H], big[4 * H_PAD:4 * H_PAD + H, :H])
    w3 = samp(big[H_PAD:H_PAD + H, :2], big[3 * H_PAD:3 * H_PAD + H, :2],
              big[5 * H_PAD:5 * H_PAD + H, :2])

    h1 = x * w1[None, :] + b1[None, :]
    a1 = jnp.maximum(h1, 0.0)
    h2 = a1 @ w2 + b2[None, :]
    a2 = jnp.maximum(h2, 0.0)
    h3 = a2 @ w3 + b3[None, :]
    means = h3[:, :1]
    stds = MIN_STD + _softplus(h3[:, 1:2])
    return means, stds


if __name__ == "__main__":
    key = jax.random.PRNGKey(0)
    pkey, xkey = jax.random.split(key)

    input_size, hidden_size, batch = 1, 10, 8
    params = init_params(pkey, input_size=input_size, hidden_size=hidden_size)
    x = jax.random.normal(xkey, (batch, input_size), dtype=jnp.float32)

    means, stds = bbb_het_reg_forward(x, params)
    means = jax.block_until_ready(means)
    stds = jax.block_until_ready(stds)

    ref_means, ref_stds = reference_forward(x, params)

    assert means.shape == (batch, 1) and stds.shape == (batch, 1)
    assert bool(jnp.all(jnp.isfinite(means))) and bool(jnp.all(stds >= MIN_STD))
    assert bool(jnp.allclose(means, ref_means, rtol=2e-2, atol=2e-3))
    assert bool(jnp.allclose(stds, ref_stds, rtol=2e-2, atol=2e-3))
    print("KERNEL_OK")
</pallas_src>

<mosaic_0001>
module attributes {stable_mosaic.version = 11 : i64} {
  func.func @kernel(%arg0: i32, %arg1: memref<8x1xf32, #tpu.memory_space<vmem>>, %arg2: memref<24x128xf32, #tpu.memory_space<vmem>>, %arg3: memref<96x128xf32, #tpu.memory_space<vmem>>, %arg4: memref<8x128xf32, #tpu.memory_space<vmem>>) attributes {dimension_semantics = [#tpu.dimension_semantics<parallel>], iteration_bounds = array<i64: 1>, scalar_prefetch = 0 : i64, scratch_operands = 0 : i64, tpu.core_type = #tpu.core_type<tc>, window_params = [{transform_indices = @transform_0, window_bounds = array<i64: 8, 1>}, {pipeline_mode = #tpu.pipeline_mode<synchronous>, transform_indices = @transform_1, window_bounds = array<i64: 24, 128>}, {pipeline_mode = #tpu.pipeline_mode<synchronous>, transform_indices = @transform_2, window_bounds = array<i64: 96, 128>}, {transform_indices = @transform_3, window_bounds = array<i64: 8, 128>}]} {
    %c0 = arith.constant 0 : index
    %c0_0 = arith.constant 0 : index
    %0 = vector.load %arg2[%c0, %c0_0] : memref<24x128xf32, #tpu.memory_space<vmem>>, vector<24x128xf32>
    %1 = vector.extract_strided_slice %0 {offsets = [0, 0], sizes = [8, 128], strides = [1, 1]} : vector<24x128xf32> to vector<8x128xf32>
    %2 = vector.extract_strided_slice %0 {offsets = [8, 0], sizes = [8, 128], strides = [1, 1]} : vector<24x128xf32> to vector<8x128xf32>
    %cst = arith.constant 2.000000e+01 : f32
    %3 = vector.broadcast %cst : f32 to vector<8x128xf32>
    %4 = arith.cmpf ogt, %2, %3 : vector<8x128xf32>
    %cst_1 = arith.constant 2.000000e+01 : f32
    %5 = vector.broadcast %cst_1 : f32 to vector<8x128xf32>
    %6 = arith.minimumf %2, %5 : vector<8x128xf32>
    %7 = math.exp %6 : vector<8x128xf32>
    %8 = math.log1p %7 : vector<8x128xf32>
    %9 = arith.select %4, %2, %8 : vector<8x128xi1>, vector<8x128xf32>
    %10 = vector.extract_strided_slice %0 {offsets = [16, 0], sizes = [8, 128], strides = [1, 1]} : vector<24x128xf32> to vector<8x128xf32>
    %11 = arith.mulf %9, %10 : vector<8x128xf32>
    %12 = arith.addf %1, %11 : vector<8x128xf32>
    %13 = vector.extract_strided_slice %12 {offsets = [0, 0], sizes = [1, 128], strides = [1, 1]} : vector<8x128xf32> to vector<1x128xf32>
    %14 = vector.extract_strided_slice %12 {offsets = [1, 0], sizes = [1, 128], strides = [1, 1]} : vector<8x128xf32> to vector<1x128xf32>
    %15 = vector.extract_strided_slice %12 {offsets = [2, 0], sizes = [1, 128], strides = [1, 1]} : vector<8x128xf32> to vector<1x128xf32>
    %16 = vector.extract_strided_slice %12 {offsets = [3, 0], sizes = [1, 128], strides = [1, 1]} : vector<8x128xf32> to vector<1x128xf32>
    %c0_2 = arith.constant 0 : index
    %c0_3 = arith.constant 0 : index
    %17 = vector.load %arg3[%c0_2, %c0_3] : memref<96x128xf32, #tpu.memory_space<vmem>>, vector<96x128xf32>
    %18 = vector.extract_strided_slice %17 {offsets = [0, 0], sizes = [32, 128], strides = [1, 1]} : vector<96x128xf32> to vector<32x128xf32>
    %19 = vector.extract_strided_slice %17 {offsets = [32, 0], sizes = [32, 128], strides = [1, 1]} : vector<96x128xf32> to vector<32x128xf32>
    %20 = vector.extract_strided_slice %17 {offsets = [64, 0], sizes = [32, 128], strides = [1, 1]} : vector<96x128xf32> to vector<32x128xf32>
    %cst_4 = arith.constant 2.000000e+01 : f32
    %21 = vector.broadcast %cst_4 : f32 to vector<32x128xf32>
    %22 = arith.cmpf ogt, %19, %21 : vector<32x128xf32>
    %cst_5 = arith.constant 2.000000e+01 : f32
    %23 = vector.broadcast %cst_5 : f32 to vector<32x128xf32>
    %24 = arith.minimumf %19, %23 : vector<32x128xf32>
    %25 = math.exp %24 : vector<32x128xf32>
    %26 = math.log1p %25 : vector<32x128xf32>
    %27 = arith.select %22, %19, %26 : vector<32x128xi1>, vector<32x128xf32>
    %28 = arith.mulf %27, %20 : vector<32x128xf32>
    %29 = arith.addf %18, %28 : vector<32x128xf32>
    %cst_6 = arith.constant 0.000000e+00 : f32
    %30 = vector.broadcast %cst_6 : f32 to vector<112x128xf32>
    %31 = vector.extract_strided_slice %29 {offsets = [0, 0], sizes = [16, 128], strides = [1, 1]} : vector<32x128xf32> to vector<16x128xf32>
    %32 = tpu.concatenate %31, %30 in 0 : vector<16x128xf32>, vector<112x128xf32> -> vector<128x128xf32>
    %33 = vector.extract_strided_slice %29 {offsets = [16, 0], sizes = [16, 128], strides = [1, 1]} : vector<32x128xf32> to vector<16x128xf32>
    %34 = tpu.concatenate %33, %30 in 0 : vector<16x128xf32>, vector<112x128xf32> -> vector<128x128xf32>
    %c0_7 = arith.constant 0 : index
    %c0_8 = arith.constant 0 : index
    %35 = vector.load %arg1[%c0_7, %c0_8] : memref<8x1xf32, #tpu.memory_space<vmem>>, vector<8x1xf32>
    %36 = vector.broadcast %35 : vector<8x1xf32> to vector<8x128xf32>
    %37 = vector.broadcast %13 : vector<1x128xf32> to vector<8x128xf32>
    %38 = arith.mulf %36, %37 : vector<8x128xf32>
    %39 = vector.broadcast %14 : vector<1x128xf32> to vector<8x128xf32>
    %40 = arith.addf %38, %39 : vector<8x128xf32>
    %cst_9 = arith.constant 0.000000e+00 : f32
    %41 = vector.broadcast %cst_9 : f32 to vector<8x128xf32>
    %42 = arith.maximumf %40, %41 : vector<8x128xf32>
    %cst_10 = arith.constant dense<0.000000e+00> : vector<8x128xf32>
    %43 = tpu.matmul %42, %32, %cst_10 {dimension_numbers = #tpu.dot_dimension_numbers<[1], [0], [0], [1], [0, 0, 1, 1], [], []>} : vector<8x128xf32>, vector<128x128xf32>, vector<8x128xf32> -> vector<8x128xf32>
    %44 = vector.broadcast %15 : vector<1x128xf32> to vector<8x128xf32>
    %45 = arith.addf %43, %44 : vector<8x128xf32>
    %cst_11 = arith.constant 0.000000e+00 : f32
    %46 = vector.broadcast %cst_11 : f32 to vector<8x128xf32>
    %47 = arith.maximumf %45, %46 : vector<8x128xf32>
    %cst_12 = arith.constant dense<0.000000e+00> : vector<8x128xf32>
    %48 = tpu.matmul %47, %34, %cst_12 {dimension_numbers = #tpu.dot_dimension_numbers<[1], [0], [0], [1], [0, 0, 1, 1], [], []>} : vector<8x128xf32>, vector<128x128xf32>, vector<8x128xf32> -> vector<8x128xf32>
    %49 = vector.broadcast %16 : vector<1x128xf32> to vector<8x128xf32>
    %50 = arith.addf %48, %49 : vector<8x128xf32>
    %c0_13 = arith.constant 0 : index
    %c0_14 = arith.constant 0 : index
    %51 = vector.load %arg4[%c0_13, %c0_14] : memref<8x128xf32, #tpu.memory_space<vmem>>, vector<8x128xf32>
    tpu.vector_store %arg4[%c0_13, %c0_14], %50 {strides = array<i32>} : memref<8x128xf32, #tpu.memory_space<vmem>>, vector<8x128xf32>,
    return
  }
  func.func @transform_0(%arg0: i32) -> (i32, i32) {
    %c0_i32 = arith.constant 0 : i32
    %c0_i32_0 = arith.constant 0 : i32
    return %arg0, %c0_i32 : i32, i32
  }
  func.func @transform_1(%arg0: i32) -> (i32, i32) {
    %c0_i32 = arith.constant 0 : i32
    %c0_i32_0 = arith.constant 0 : i32
    %c0_i32_1 = arith.constant 0 : i32
    return %c0_i32, %c0_i32_0 : i32, i32
  }
  func.func @transform_2(%arg0: i32) -> (i32, i32) {
    %c0_i32 = arith.constant 0 : i32
    %c0_i32_0 = arith.constant 0 : i32
    %c0_i32_1 = arith.constant 0 : i32
    return %c0_i32, %c0_i32_0 : i32, i32
  }
  func.func @transform_3(%arg0: i32) -> (i32, i32) {
    %c0_i32 = arith.constant 0 : i32
    %c0_i32_0 = arith.constant 0 : i32
    return %arg0, %c0_i32 : i32, i32
  }
}

</mosaic_0001>

<bundles_post_ra>
// kernel: tpu_custom_call.1
= control target key start
LH: loop header
LB: loop body
LE: loop exit
PB: predicated region body
PF: predicated region fallthrough
CT: control target
= control target key end

     0   :  { %8 = vsyncpa [#allocation3], 0  ;;  %s488_s0 = inlined_call_operand.vmem [shape: f32[8,1], index: 0, kind: input, shape index: {}]   ;;  %s489_s1 = inlined_call_operand.hbm [shape: f32[24,128], index: 1, kind: input, shape index: {}]   ;;  %s490_s2 = inlined_call_operand.hbm [shape: f32[96,128], index: 2, kind: input, shape index: {}]   ;;  %s491_s3 = inlined_call_operand.hbm [shape: f32[8,128], index: 3, kind: output, shape index: {}]  }
   0x1   :  { %9 = vsyncpa [#allocation6], 0 }
   0x2   :  { %10 = vsyncpa [#allocation4], 0  ;;  %s436_s12 = smov [#allocation2]  }
   0x3   :  { %s18_s13 = sshll.u32 %s436_s12, 4  ;;  %s19_s13 = int_to_ptr.vmem [resolvable:$true] %s18_s13 }
   0x4   :  { %s378_s14 = scalar_lea.vmem %s19_s13, 384  ;;  %p383_p1 = scmp.lt.s32.totalorder %s19_s13, %s19_s13 }
   0x5   :  { %p379_p0 = scmp.ne.s32.totalorder %s19_s13, %s378_s14  ;;  %p384_p2 = scmp.lt.s32.totalorder %s378_s14, %s378_s14 }
   0x7   :  { %p385_p3 = por %p384_p2, %p383_p1 }
   0x9   :  { %p386_p4 = pnand %p385_p3, %p379_p0 }
   0xb   :  { %389 = shalt.err (!%p386_p4)
}
   0xc   :  { %s437_s15 = smov 128   ;;  %s438_s16 = smov 8  }
   0xd   :  { %24 = dma.hbm_to_vmem [thread:$0]  %s489_s1, 384, %s19_s13, [#allocation3], %s437_s15, %s437_s15, %s438_s16  }
   0xe   :  { %s439_s19 = smov [#allocation5]  }
   0xf   :  { %s30_s20 = sshll.u32 %s439_s19, 4  ;;  %s31_s20 = int_to_ptr.vmem [resolvable:$true] %s30_s20 }
  0x10   :  { %s398_s21 = scalar_lea.vmem %s31_s20, 1536  ;;  %p403_p6 = scmp.lt.s32.totalorder %s31_s20, %s31_s20 }
  0x11   :  { %p399_p5 = scmp.ne.s32.totalorder %s31_s20, %s398_s21  ;;  %p404_p7 = scmp.lt.s32.totalorder %s398_s21, %s398_s21 }
  0x13   :  { %p405_p8 = por %p404_p7, %p403_p6 }
  0x15   :  { %p406_p9 = pnand %p405_p8, %p399_p5 }
  0x17   :  { %409 = shalt.err (!%p406_p9)
}
  0x18   :  { %36 = dma.hbm_to_vmem [thread:$0]  %s490_s2, 1536, %s31_s20, [#allocation6], %s437_s15, %s437_s15, %s438_s16  }
  0x19   :  { %430 = dma.done.wait [#allocation3], 384  }
  0x1a   :  { %431 = vsyncadd [#allocation3], 4294966912 }
  0x1b   :  { %432 = dma.done.wait [#allocation6], 1536  }
  0x1c   :  { %433 = vsyncadd [#allocation6], 4294965760  ;;  %v440_v0 = vmov 0   ;;  %v441_v1 = vmov 0.0   ;;  %v138_v2 = vld [vmem:[%s488_s0] sm:$0xff]  ;;  %v66_v5 = vld [vmem:[#allocation5 + $0x20] sm:$0xff]  ;;  %v144_v49 = vlaneseq }
  0x1d   :  { %349 = vset.pattern.permute.xlu0 %v440_v0  ;;  %327 = vmatprep.subr.mxu0 %v441_v1  ;;  %v67_v3 = vld [vmem:[#allocation5 + $0x28] sm:$0xff]  ;;  %vm442_vm0 = vmmov 0   ;;  %v78_v6 = vmin.f32 %v66_v5, 20.0  ;;  %vm74_vm4 = vcmp.gt.f32.partialorder %v66_v5, 20.0  ;;  %v70_v27 = vld [vmem:[#allocation5 + $0x40] sm:$0xff]  ;;  %v44_v37 = vld [vmem:[#allocation2 + $0x8] sm:$0xff] }
  0x1e   :  { %334 = vmatprep.subr.mxu1 %v441_v1  ;;  %141 = vperm.xlu0 %349, %v138_v2   ;;  %v79_v4 = vmin.f32 %v67_v3, 20.0  ;;  %vm75_vm2 = vcmp.gt.f32.partialorder %v67_v3, 20.0  ;;  %v71_v24 = vld [vmem:[#allocation5 + $0x48] sm:$0xff]  ;;  %v62_v32 = vld [vmem:[#allocation5] sm:$0xff]  ;;  %v47_v38 = vmin.f32 %v44_v37, 20.0  ;;  %vm46_vm6 = vcmp.gt.f32.partialorder %v44_v37, 20.0 }
  0x1f   :  { %331 = vmatprep.mubr.msk.f32.mxu0 %vm442_vm0, %v441_v1  ;;  %338 = vmatprep.mubr.msk.f32.mxu1 %vm442_vm0, %v441_v1  ;;  %v82_v8 = vmul.f32 1.442695, %v78_v6  ;;  %v63_v28 = vld [vmem:[#allocation5 + $0x8] sm:$0xff]  ;;  %v45_v50 = vld [vmem:[#allocation2 + $0x10] sm:$0xff]  ;;  %v478_v52 = vshrl.u32 %v144_v49, 7  ;;  %s443_s0 = smov [#allocation7]  }
  0x20   :  { %v84_v7 = vmul.f32 1.442695, %v79_v4  ;;  %v48_v39 = vmul.f32 1.442695, %v47_v38  ;;  %v43_v54 = vld [vmem:[#allocation2] sm:$0xff]  ;;  %v69_v0 = vld [vmem:[#allocation5 + $0x38] sm:$0xff] }
  0x21   :  { %v146_v55 = vsub.s32 0, %v478_v52  ;;  %v151_v57 = vsub.s32 1, %v478_v52  ;;  %v81_v2 = vmin.f32 %v69_v0, 20.0  ;;  %vm77_vm8 = vcmp.gt.f32.partialorder %v69_v0, 20.0  ;;  %s311_s2 = sshll.u32 %s443_s0, 4  ;;  %s312_s2 = int_to_ptr.vmem [resolvable:$true] %s311_s2 }
  0x22   :  { %350 = vpow2.f32 %v84_v7  ;;  %s410_s25 = scalar_lea.vmem %s312_s2, 128  ;;  %p415_p11 = scmp.lt.s32.totalorder %s312_s2, %s312_s2 }
  0x23   :  { %352 = vpow2.f32 %v82_v8  ;;  %v88_v4 = vmul.f32 1.442695, %v81_v2  ;;  %p411_p10 = scmp.ne.s32.totalorder %s312_s2, %s410_s25  ;;  %p416_p12 = scmp.lt.s32.totalorder %s410_s25, %s410_s25 }
  0x25   :  { %p417_p13 = por %p416_p12, %p415_p11 }
  0x27   :  { %p418_p0 = pnand %p417_p13, %p411_p10 }
  0x2f   :  { %v351_v9 = vpop.eup %350 }
  0x30   :  { %v353_v10 = vpop.eup %352  ;;  %v99_v11 = vadd.f32 1.0, %v351_v9  ;;  %v102_v13 = vmul.f32 -0.5, %v351_v9  ;;  %v105_v16 = vand.u32 2147483647, %v351_v9 }
  0x31   :  { %v90_v12 = vadd.f32 1.0, %v353_v10  ;;  %v93_v14 = vmul.f32 -0.5, %v353_v10  ;;  %v96_v18 = vand.u32 2147483647, %v353_v10 }
  0x32   :  { %354 = vlog2.f32 %v99_v11  ;;  %v103_v15 = vadd.f32 1.0, %v102_v13  ;;  %vm106_vm1 = vcmp.lt.f32.partialorder %v105_v16, 0.0004427343 }
  0x33   :  { %356 = vlog2.f32 %v90_v12  ;;  %v94_v17 = vadd.f32 1.0, %v93_v14  ;;  %vm97_vm3 = vcmp.lt.f32.partialorder %v96_v18, 0.0004427343 }
  0x34   :  { %v104_v19 = vmul.f32 %v351_v9, %v103_v15  ;;  %358 = vpow2.f32 %v48_v39 }
  0x35   :  { %v95_v21 = vmul.f32 %v353_v10, %v94_v17 }
  0x3f   :  { %v355_v20 = vpop.eup %354 }
  0x40   :  { %v357_v22 = vpop.eup %356  ;;  %v101_v23 = vmul.f32 0.6931472, %v355_v20 }
  0x41   :  { %v92_v25 = vmul.f32 0.6931472, %v357_v22  ;;  %v359_v40 = vpop.eup %358 }
  0x42   :  { %v107_v26 = vsel %vm106_vm1, %v104_v19, %v101_v23  ;;  %v50_v41 = vadd.f32 1.0, %v359_v40  ;;  %v53_v42 = vmul.f32 -0.5, %v359_v40  ;;  %v56_v45 = vand.u32 2147483647, %v359_v40 }
  0x43   :  { %v127_v29 = vsel %vm75_vm2, %v67_v3, %v107_v26  ;;  %v98_v30 = vsel %vm97_vm3, %v95_v21, %v92_v25  ;;  %v68_v3 = vld [vmem:[#allocation5 + $0x30] sm:$0xff] }
  0x44   :  { %v131_v31 = vmul.f32 %v127_v29, %v71_v24  ;;  %v126_v33 = vsel %vm74_vm4, %v66_v5, %v98_v30  ;;  %360 = vlog2.f32 %v50_v41  ;;  %v54_v43 = vadd.f32 1.0, %v53_v42  ;;  %v73_v24 = vld [vmem:[#allocation5 + $0x58] sm:$0xff]  ;;  %v72_v29 = vld [vmem:[#allocation5 + $0x50] sm:$0xff] }
  0x45   :  { %v130_v34 = vmul.f32 %v126_v33, %v70_v27  ;;  %vm57_vm5 = vcmp.lt.f32.partialorder %v56_v45, 0.0004427343  ;;  %v80_v5 = vmin.f32 %v68_v3, 20.0  ;;  %362 = vpow2.f32 %v88_v4  ;;  %v64_v33 = vld [vmem:[#allocation5 + $0x10] sm:$0xff] }
  0x46   :  { %v135_v35 = vadd.f32 %v131_v31, %v63_v28  ;;  %v55_v47 = vmul.f32 %v359_v40, %v54_v43  ;;  %vm76_vm10 = vcmp.gt.f32.partialorder %v68_v3, 20.0  ;;  %v65_v28 = vld [vmem:[#allocation5 + $0x18] sm:$0xff]  ;;  %v232_v41 = vsub.s32 3, %v478_v52 }
  0x47   :  { %v134_v36 = vadd.f32 %v130_v34, %v62_v32  ;;  %v86_v6 = vmul.f32 1.442695, %v80_v5 }
  0x48   :  { %328 = vmatpush3.msra.mxu0 %v135_v35  ;;  %v157_v35 = vsub.s32 2, %v478_v52 }
  0x49   :  { %329 = vmatprep.subr.mxu0 %v441_v1  ;;  %364 = vpow2.f32 %v86_v6 }
  0x4a   :  { %330 = vmatpush3.msra.mxu0 %v134_v36 }
  0x51   :  { %v361_v44 = vpop.eup %360 }
  0x52   :  { %v52_v46 = vmul.f32 0.6931472, %v361_v44  ;;  %v363_v7 = vpop.eup %362 }
  0x53   :  { %v117_v8 = vadd.f32 1.0, %v363_v7  ;;  %v120_v11 = vmul.f32 -0.5, %v363_v7  ;;  %v123_v15 = vand.u32 2147483647, %v363_v7 }
  0x54   :  { %v58_v48 = vsel %vm57_vm5, %v55_v47, %v52_v46 }
  0x55   :  { %v59_v51 = vsel %vm46_vm6, %v44_v37, %v58_v48  ;;  %366 = vlog2.f32 %v117_v8  ;;  %v121_v12 = vadd.f32 1.0, %v120_v11  ;;  %vm124_vm7 = vcmp.lt.f32.partialorder %v123_v15, 0.0004427343 }
  0x56   :  { %v60_v53 = vmul.f32 %v59_v51, %v45_v50  ;;  %v365_v9 = vpop.eup %364 }
  0x57   :  { %v108_v10 = vadd.f32 1.0, %v365_v9  ;;  %v111_v13 = vmul.f32 -0.5, %v365_v9  ;;  %v122_v17 = vmul.f32 %v363_v7, %v121_v12  ;;  %v114_v20 = vand.u32 2147483647, %v365_v9 }
  0x58   :  { %v61_v56 = vadd.f32 %v60_v53, %v43_v54 }
  0x59   :  { %368 = vlog2.f32 %v108_v10  ;;  %v112_v18 = vadd.f32 1.0, %v111_v13  ;;  %vm115_vm9 = vcmp.lt.f32.partialorder %v114_v20, 0.0004427343 }
  0x5a   :  { %v147_v58 = vrot.slane %v61_v56, %v146_v55  ;;  %v152_v59 = vrot.slane %v61_v56, %v151_v57  ;;  %v158_v36 = vrot.slane %v61_v56, %v157_v35  ;;  %v233_v42 = vrot.slane %v61_v56, %v232_v41 }
  0x5b   :  { %v113_v23 = vmul.f32 %v365_v9, %v112_v18 }
  0x62   :  { %v367_v14 = vpop.eup %366 }
  0x63   :  { %v119_v16 = vmul.f32 0.6931472, %v367_v14 }
  0x65   :  { %v125_v21 = vsel %vm124_vm7, %v122_v17, %v119_v16 }
  0x66   :  { %v369_v19 = vpop.eup %368  ;;  %v129_v25 = vsel %vm77_vm8, %v69_v0, %v125_v21 }
  0x67   :  { %v110_v22 = vmul.f32 0.6931472, %v369_v19  ;;  %v133_v26 = vmul.f32 %v129_v25, %v73_v24 }
  0x69   :  { %v116_v27 = vsel %vm115_vm9, %v113_v23, %v110_v22  ;;  %v137_v31 = vadd.f32 %v133_v26, %v65_v28 }
  0x6a   :  { %v128_v30 = vsel %vm76_vm10, %v68_v3, %v116_v27 }
  0x6b   :  { %v132_v32 = vmul.f32 %v128_v30, %v72_v29  ;;  %335 = vmatpush3.msra.mxu1 %v137_v31 }
  0x6c   :  { %336 = vmatprep.subr.mxu1 %v441_v1 }
  0x6d   :  { %v136_v34 = vadd.f32 %v132_v32, %v64_v33 }
  0x6f   :  { %337 = vmatpush3.msra.mxu1 %v136_v34 }
  0x99   :  { %v142_v60 = vpop.permute.xlu0 %141 }
  0x9a   :  { %v148_v61 = vmul.f32 %v147_v58, %v142_v60 }
  0x9c   :  { %v153_v62 = vadd.f32 %v152_v59, %v148_v61 }
  0x9e   :  { %v154_v63 = vmax.f32 %v153_v62, 0.0 }
  0xa0   :  { %332 = vmatmul.mubr.f32.vlgmr.msra.gmra.mxu0 %v154_v63 }
 0x160   :  { %v225_v37 = vpop.f32.mrf.mxu0 }
 0x161   :  { %v226_v38 = vadd.f32 %v225_v37, %v158_v36 }
 0x162   :  { %v333_v39 = vpop.f32.mrf.mxu0 }
 0x163   :  { %v229_v40 = vmax.f32 %v226_v38, 0.0 }
 0x165   :  { %339 = vmatmul.mubr.f32.vlgmr.msra.gmra.mxu1 %v229_v40 }
 0x225   :  { %v300_v43 = vpop.f32.mrf.mxu1 }
 0x226   :  { %v301_v44 = vadd.f32 %v300_v43, %v233_v42 }
 0x227   :  { %v340_v45 = vpop.f32.mrf.mxu1 }
 0x228   :  { %304 = vst [vmem:[#allocation7] sm:$0xff] %v301_v44 }
 0x229   :  { %421 = shalt.err (!%p418_p0)
}
 0x22a   :  { %314 = dma.vmem_to_hbm [thread:$0]  %s312_s2, 128, %s491_s3, [#allocation4]  }
 0x22b   :  { %434 = dma.done.wait [#allocation4], 128  }
 0x22c   :  { %435 = vsyncadd [#allocation4], 4294967168 }
 0x22d   :  { %318 = vsyncpa [#allocation3], 1 }
 0x22e   :  { %319 = vsyncpa [#allocation6], 1 }
 0x22f   :  { %320 = vsyncpa [#allocation4], 1 }

</bundles_post_ra>
